<compile_context>
chip_gen: v7x
topology: tpu7x:2x2x1
jax: 0.10.0
libtpu: 0.0.40
codegen_flags: <defaults>
</compile_context>

<pallas_src>
import functools

import numpy as np
import jax
import jax.numpy as jnp
from jax.experimental import pallas as pl
from jax.experimental.pallas import tpu as pltpu

_OUT_LANES = 128


def _round_up(x, m):
    return (x + m - 1) // m * m


def _criterion_kernel(logits_ref, tgt_ref, tgt_len_ref,
                      src_box_ref, tgt_box_ref, mask_ref, nb_ref,
                      out_ref,
                      ce_num_acc, ce_den_acc, card_acc,
                      *, num_classes, eos_coef, q_real, b_real, tile_q):
    i = pl.program_id(0)
    nt = pl.num_programs(0)

    @pl.when(i == 0)
    def _init():
        ce_num_acc[...] = jnp.zeros_like(ce_num_acc)
        ce_den_acc[...] = jnp.zeros_like(ce_den_acc)
        card_acc[...] = jnp.zeros_like(card_acc)

    # f32 path kept everywhere for v5e compatibility (no bf16 VPU/EUP there) and
    # numerical fidelity with the torch reference.
    logits = logits_ref[...]                                   # [B, TQ, K] f32
    tgt = tgt_ref[...]                                         # [B, TQ, 1] int32

    # ---------------- loss_labels: weighted cross-entropy (streamed) ----------
    m = jnp.max(logits, axis=-1, keepdims=True)                # [B, TQ, 1]
    lse = jnp.log(jnp.sum(jnp.exp(logits - m), axis=-1, keepdims=True)) + m
    iota_k = jax.lax.broadcasted_iota(jnp.int32, logits.shape, 2)
    true_logit = jnp.sum(jnp.where(iota_k == tgt, logits, 0.0),
                         axis=-1, keepdims=True)               # [B, TQ, 1]
    nll = lse - true_logit

    # rows beyond the real Q (only present on the tiled fallback path) are padding
    q0 = i * tile_q
    iota_q = jax.lax.broadcasted_iota(jnp.int32, tgt.shape, 1)
    valid = (q0 + iota_q) < q_real                             # [B, TQ, 1] bool

    # empty_weight is all-ones except eos_coef at the no-object class, so no
    # one-hot gather / [B,Q,K] weight multiply is needed.
    wt = jnp.where(tgt == num_classes, jnp.float32(eos_coef), jnp.float32(1.0))
    wt = jnp.where(valid, wt, 0.0)

    # per-image partials only (sublane reduce); scalar collapse deferred to finalize
    ce_num_acc[...] += jnp.sum(wt * nll, axis=1, keepdims=True)   # [B,1,1]
    ce_den_acc[...] += jnp.sum(wt, axis=1, keepdims=True)         # [B,1,1]

    # ---------------- loss_cardinality ----------------------------------------
    # argmax(logits) != no_object  <=>  max logit > no-object logit.
    # Static single-lane slice: removes the second full-lane reduce + its
    # full-tile masked temporary (XLU is the saturating slot here).
    # Exact ties count as "empty".
    noobj = logits[:, :, num_classes:num_classes + 1]          # [B, TQ, 1]
    not_empty = jnp.logical_and(m > noobj, valid).astype(jnp.float32)
    card_acc[...] += jnp.sum(not_empty, axis=1, keepdims=True)    # [B,1,1]

    # ---------------- finalize: collapse, box losses, single lane-dense store --
    @pl.when(i == nt - 1)
    def _finalize():
        num = jnp.sum(ce_num_acc[...], keepdims=True)          # (1,1,1)
        den = jnp.sum(ce_den_acc[...], keepdims=True)          # (1,1,1)
        ce = num / jnp.maximum(den, 1e-12)                     # guard eos_coef==0 edge
        card_err = jnp.sum(jnp.abs(card_acc[...] - tgt_len_ref[...]),
                           keepdims=True) / b_real             # (1,1,1)

        nb = nb_ref[0]                                         # SMEM f32 scalar
        src = src_box_ref[...]                                 # [1, Np, 4] cxcywh
        tgt_b = tgt_box_ref[...]                               # [1, Np, 4]
        msk = mask_ref[...]                                    # [1, Np, 1]

        l1 = jnp.where(msk > 0, jnp.abs(src - tgt_b), 0.0)
        loss_bbox = jnp.sum(l1, keepdims=True) / nb            # (1,1,1)

        def to_xyxy(b):
            cc = b[..., 0:2]
            wh = b[..., 2:4]
            return cc - 0.5 * wh, cc + 0.5 * wh

        lo_a, hi_a = to_xyxy(src)
        lo_b, hi_b = to_xyxy(tgt_b)

        def prod2(x):                                          # [1, Np, 2] -> [1, Np, 1]
            return x[..., 0:1] * x[..., 1:2]

        area_a = prod2(hi_a - lo_a)
        area_b = prod2(hi_b - lo_b)
        inter = prod2(jnp.maximum(jnp.minimum(hi_a, hi_b) - jnp.maximum(lo_a, lo_b), 0.0))
        area_e = prod2(jnp.maximum(jnp.maximum(hi_a, hi_b) - jnp.minimum(lo_a, lo_b), 0.0))
        union = area_a + area_b - inter
        # NaN-safe denominators for the zero-padded (masked) rows.
        union_s = jnp.where(msk > 0, union, 1.0)
        area_e_s = jnp.where(msk > 0, area_e, 1.0)
        iou = inter / union_s
        giou = iou - (area_e_s - union_s) / area_e_s
        loss_giou = jnp.sum(jnp.where(msk > 0, 1.0 - giou, 0.0), keepdims=True) / nb

        lane = jax.lax.broadcasted_iota(jnp.int32, (1, 1, _OUT_LANES), 2)
        out_ref[...] = (jnp.where(lane == 0, ce, 0.0)
                        + jnp.where(lane == 1, card_err, 0.0)
                        + jnp.where(lane == 2, loss_bbox, 0.0)
                        + jnp.where(lane == 3, loss_giou, 0.0))


def _run_criterion_kernel(logits, tgt_classes, tgt_lengths,
                          src_boxes, tgt_boxes, box_mask, num_boxes,
                          *, num_classes, eos_coef, q_real, tile_q, vmem_limit):
    B, q_pad, K = logits.shape
    np_boxes = src_boxes.shape[1]
    grid = (q_pad // tile_q,)
    kernel = functools.partial(
        _criterion_kernel,
        num_classes=num_classes, eos_coef=float(eos_coef),
        q_real=q_real, b_real=float(B), tile_q=tile_q)
    # TODO(synk): on v7x (2 TensorCores) a leading core-parallel grid axis with
    # per-core partial accumulators would give up to ~2x; single-core kept here
    # since the common case is a single grid step.
    return pl.pallas_call(
        kernel,
        out_shape=jax.ShapeDtypeStruct((1, 1, _OUT_LANES), jnp.float32),
        grid_spec=pltpu.PrefetchScalarGridSpec(
            num_scalar_prefetch=0,
            grid=grid,
            in_specs=[
                pl.BlockSpec((B, tile_q, K), lambda i: (0, i, 0)),    # logits (f32)
                pl.BlockSpec((B, tile_q, 1), lambda i: (0, i, 0)),    # target classes
                pl.BlockSpec((B, 1, 1), lambda i: (0, 0, 0)),         # target lengths
                pl.BlockSpec((1, np_boxes, 4), lambda i: (0, 0, 0)),  # matched src boxes
                pl.BlockSpec((1, np_boxes, 4), lambda i: (0, 0, 0)),  # matched tgt boxes
                pl.BlockSpec((1, np_boxes, 1), lambda i: (0, 0, 0)),  # pair mask
                pl.BlockSpec(memory_space=pltpu.MemorySpace.SMEM),    # num_boxes scalar
            ],
            out_specs=pl.BlockSpec((1, 1, _OUT_LANES), lambda i: (0, 0, 0)),
            scratch_shapes=[
                pltpu.VMEM((B, 1, 1), jnp.float32),   # per-image CE numerator
                pltpu.VMEM((B, 1, 1), jnp.float32),   # per-image CE denominator
                pltpu.VMEM((B, 1, 1), jnp.float32),   # per-image cardinality count
            ],
        ),
        compiler_params=pltpu.CompilerParams(
            dimension_semantics=("arbitrary",),
            vmem_limit_bytes=int(vmem_limit)),
    )(logits, tgt_classes, tgt_lengths, src_boxes, tgt_boxes, box_mask, num_boxes)


class SetCriterionPallas:
    """DETR SetCriterion with losses = ['labels', 'cardinality', 'boxes'].

    HOI branches (loss_pair_labels / loss_pair_actions) are inactive because
    HOI_losses=None (same as the PyTorch module constructed without HOI args).
    """

    def __init__(self, num_classes, eos_coef,
                 losses=('labels', 'cardinality', 'boxes'),
                 max_matched=8):
        self.num_classes = num_classes
        self.eos_coef = float(eos_coef)
        self.losses = losses
        self.max_matched = max_matched

    # ---- per-generation VMEM budgeting (v5e/v6e: 128 MiB, v7x: 64 MiB) --------
    def _vmem_budget(self):
        cap = 128 << 20
        try:
            info = pltpu.get_tpu_info()
            cap = int(getattr(info, 'vmem_capacity_bytes', cap)) or cap
        except Exception:
            pass
        # tile working-set budget: ~1/4 physical, capped (=> 32 MiB v5e/v6e, 16 MiB v7x)
        budget = min(cap // 4, 32 << 20)
        # explicit scoped-VMEM request with headroom below physical
        vmem_limit = min(cap * 3 // 4, 96 << 20)
        return budget, vmem_limit

    def _matcher(self, outputs, targets):
        # TODO(synk): the Hungarian matcher (scipy linear_sum_assignment) is a
        # data-dependent combinatorial solver with no Pallas equivalent; use a
        # deterministic identity matching (query i <-> gt i) instead.
        return [(np.arange(len(t['labels'])), np.arange(len(t['labels'])))
                for t in targets]

    def forward(self, outputs, targets):
        logits = jnp.asarray(outputs['pred_logits'], jnp.float32)        # [B, Q, K]
        boxes = jnp.asarray(outputs['pred_boxes'], jnp.float32)          # [B, Q, 4]
        B, Q, K = logits.shape
        assert K == self.num_classes + 1
        indices = self._matcher(outputs, targets)

        # num_boxes (world_size = 1, no all_reduce), clamp(min=1)
        num_boxes = max(sum(len(t['labels']) for t in targets), 1)

        # ---- adaptive Q tiling by VMEM byte budget.
        # Live set per query row ~ B*K*4B * (double-buffered input + f32 temps).
        budget, vmem_limit = self._vmem_budget()
        per_q_bytes = B * K * 4 * 10
        if Q * per_q_bytes <= budget:
            tile_q = Q            # single grid step, full extent, NO Q padding
            q_pad = Q
        else:
            tile_q = max(8, (budget // per_q_bytes) // 8 * 8)
            q_pad = _round_up(Q, tile_q)

        # ---- dense target-class map [B, Q_pad, 1] + matched-pair packing
        tgt_classes = np.full((B, q_pad, 1), self.num_classes, dtype=np.int32)
        batch_idx, src_idx, tgt_labels_list, tgt_boxes_list = [], [], [], []
        for b, ((src, tgt), t) in enumerate(zip(indices, targets)):
            labels = np.asarray(t['labels'])
            gt_boxes = np.asarray(t['boxes'], dtype=np.float32)
            tgt_classes[b, src, 0] = labels[tgt]
            batch_idx.append(np.full_like(src, b))
            src_idx.append(src)
            tgt_labels_list.append(labels[tgt])
            tgt_boxes_list.append(gt_boxes[tgt])
        batch_idx = np.concatenate(batch_idx)
        src_idx = np.concatenate(src_idx)
        tgt_labels = np.concatenate(tgt_labels_list)
        tgt_boxes_np = np.concatenate(tgt_boxes_list, axis=0).astype(np.float32)
        N = batch_idx.shape[0]
        Np = self.max_matched
        assert N <= Np, "increase max_matched"

        # Static-shape glue: pad index arrays to a fixed Np (repeat a valid index;
        # the mask zeroes the padded rows) so gathers never change shape.
        pad = Np - N
        batch_idx_p = np.concatenate([batch_idx, np.zeros(pad, batch_idx.dtype)]).astype(np.int32)
        src_idx_p = np.concatenate([src_idx, np.zeros(pad, src_idx.dtype)]).astype(np.int32)
        box_mask = np.zeros((1, Np, 1), np.float32)
        box_mask[0, :N] = 1.0
        tgt_boxes_pad = np.zeros((1, Np, 4), np.float32)
        tgt_boxes_pad[0, :N] = tgt_boxes_np

        src_boxes = boxes[batch_idx_p, src_idx_p].reshape(1, Np, 4)      # static gather

        # ---- logits go straight in (no bf16 cast, no class padding, no HBM copy).
        if q_pad == Q:
            logits_in = logits
        else:
            # TODO(synk): for the huge-Q fallback, fuse this pad into the producer's
            # jit so XLA doesn't materialize a separate padded copy in HBM.
            logits_in = jnp.pad(logits, ((0, 0), (0, q_pad - Q), (0, 0)))

        tgt_lengths = np.asarray([len(t['labels']) for t in targets],
                                 np.float32).reshape(B, 1, 1)
        num_boxes_arr = jnp.asarray([float(num_boxes)], jnp.float32)     # SMEM (1,)

        out = _run_criterion_kernel(
            logits_in, jnp.asarray(tgt_classes), jnp.asarray(tgt_lengths),
            src_boxes, jnp.asarray(tgt_boxes_pad), jnp.asarray(box_mask),
            num_boxes_arr,
            num_classes=self.num_classes, eos_coef=self.eos_coef,
            q_real=Q, tile_q=tile_q, vmem_limit=vmem_limit)

        losses = {}
        if 'labels' in self.losses:
            losses['loss_ce'] = out[0, 0, 0]
            # class_error is a logging-only metric; tiny static-shape gather in JAX glue.
            matched_logits = logits[batch_idx_p, src_idx_p]              # [Np, K]
            pred = jnp.argmax(matched_logits, axis=-1)
            tgt_lab_pad = np.zeros((Np,), np.int32)
            tgt_lab_pad[:N] = tgt_labels
            correct = (pred == jnp.asarray(tgt_lab_pad)).astype(jnp.float32)
            acc = jnp.sum(correct * jnp.asarray(box_mask[0, :, 0])) / float(N) * 100.0
            losses['class_error'] = 100.0 - acc
        if 'cardinality' in self.losses:
            losses['cardinality_error'] = out[0, 0, 1]
        if 'boxes' in self.losses:
            losses['loss_bbox'] = out[0, 0, 2]
            losses['loss_giou'] = out[0, 0, 3]
        return losses


if __name__ == "__main__":
    key = jax.random.PRNGKey(0)
    B, Q, num_classes = 2, 8, 7
    K = num_classes + 1
    k1, k2, k3 = jax.random.split(key, 3)

    pred_logits = jax.random.normal(k1, (B, Q, K), jnp.float32)
    pred_boxes = jax.nn.sigmoid(jax.random.normal(k2, (B, Q, 4), jnp.float32))

    # Deterministic synthetic targets: 3 GT boxes in image 0, 2 in image 1.
    n_gt = [3, 2]
    targets = []
    for b, n in enumerate(n_gt):
        kb = jax.random.fold_in(k3, b)
        kl, kc, kw = jax.random.split(kb, 3)
        labels = np.asarray(jax.random.randint(kl, (n,), 0, num_classes, jnp.int32))
        cxcy = 0.2 + 0.6 * jax.random.uniform(kc, (n, 2), jnp.float32)
        wh = 0.1 + 0.2 * jax.random.uniform(kw, (n, 2), jnp.float32)
        boxes_np = np.asarray(jnp.concatenate([cxcy, wh], axis=-1), dtype=np.float32)
        targets.append({'labels': labels, 'boxes': boxes_np})

    criterion = SetCriterionPallas(num_classes=num_classes, eos_coef=0.1)
    losses = criterion.forward(
        {'pred_logits': pred_logits, 'pred_boxes': pred_boxes}, targets)
    losses = {k: jax.block_until_ready(v) for k, v in losses.items()}
    print("KERNEL_OK")
</pallas_src>

<mosaic_0001>
module attributes {stable_mosaic.version = 11 : i64} {
  func.func @_criterion_kernel(%arg0: i32, %arg1: memref<2x8x8xf32, #tpu.memory_space<vmem>>, %arg2: memref<2x8x1xi32, #tpu.memory_space<vmem>>, %arg3: memref<2x1x1xf32, #tpu.memory_space<vmem>>, %arg4: memref<1x8x4xf32, #tpu.memory_space<vmem>>, %arg5: memref<1x8x4xf32, #tpu.memory_space<vmem>>, %arg6: memref<1x8x1xf32, #tpu.memory_space<vmem>>, %arg7: memref<1xf32, #tpu.memory_space<smem>>, %arg8: memref<1x1x128xf32, #tpu.memory_space<vmem>>, %arg9: memref<2x1x1xf32, #tpu.memory_space<vmem>>, %arg10: memref<2x1x1xf32, #tpu.memory_space<vmem>>, %arg11: memref<2x1x1xf32, #tpu.memory_space<vmem>>) attributes {dimension_semantics = [#tpu.dimension_semantics<arbitrary>], iteration_bounds = array<i64: 1>, scalar_prefetch = 0 : i64, scratch_operands = 3 : i64, tpu.core_type = #tpu.core_type<tc>, window_params = [{transform_indices = @transform_0, window_bounds = array<i64: 2, 8, 8>}, {transform_indices = @transform_1, window_bounds = array<i64: 2, 8, 1>}, {pipeline_mode = #tpu.pipeline_mode<synchronous>, transform_indices = @transform_2, window_bounds = array<i64: 2, 1, 1>}, {pipeline_mode = #tpu.pipeline_mode<synchronous>, transform_indices = @transform_3, window_bounds = array<i64: 1, 8, 4>}, {pipeline_mode = #tpu.pipeline_mode<synchronous>, transform_indices = @transform_4, window_bounds = array<i64: 1, 8, 4>}, {pipeline_mode = #tpu.pipeline_mode<synchronous>, transform_indices = @transform_5, window_bounds = array<i64: 1, 8, 1>}, {transform_indices = @transform_6, window_bounds = array<i64: 1>}, {pipeline_mode = #tpu.pipeline_mode<synchronous>, transform_indices = @transform_7, window_bounds = array<i64: 1, 1, 128>}]} {
    %c0_i32 = arith.constant 0 : i32
    %0 = arith.cmpi eq, %arg0, %c0_i32 : i32
    %1 = arith.extui %0 : i1 to i32
    %c0_i32_0 = arith.constant 0 : i32
    %2 = arith.cmpi ne, %1, %c0_i32_0 : i32
    scf.if %2 {
      %cst_36 = arith.constant 0.000000e+00 : f32
      %59 = vector.broadcast %cst_36 : f32 to vector<2x1x1xf32>
      %c0_37 = arith.constant 0 : index
      %c0_38 = arith.constant 0 : index
      %c0_39 = arith.constant 0 : index
      %60 = vector.load %arg9[%c0_37, %c0_38, %c0_39] : memref<2x1x1xf32, #tpu.memory_space<vmem>>, vector<2x1x1xf32>
      tpu.vector_store %arg9[%c0_37, %c0_38, %c0_39], %59 {strides = array<i32>} : memref<2x1x1xf32, #tpu.memory_space<vmem>>, vector<2x1x1xf32>,
      %cst_40 = arith.constant 0.000000e+00 : f32
      %61 = vector.broadcast %cst_40 : f32 to vector<2x1x1xf32>
      %c0_41 = arith.constant 0 : index
      %c0_42 = arith.constant 0 : index
      %c0_43 = arith.constant 0 : index
      %62 = vector.load %arg10[%c0_41, %c0_42, %c0_43] : memref<2x1x1xf32, #tpu.memory_space<vmem>>, vector<2x1x1xf32>
      tpu.vector_store %arg10[%c0_41, %c0_42, %c0_43], %61 {strides = array<i32>} : memref<2x1x1xf32, #tpu.memory_space<vmem>>, vector<2x1x1xf32>,
      %cst_44 = arith.constant 0.000000e+00 : f32
      %63 = vector.broadcast %cst_44 : f32 to vector<2x1x1xf32>
      %c0_45 = arith.constant 0 : index
      %c0_46 = arith.constant 0 : index
      %c0_47 = arith.constant 0 : index
      %64 = vector.load %arg11[%c0_45, %c0_46, %c0_47] : memref<2x1x1xf32, #tpu.memory_space<vmem>>, vector<2x1x1xf32>
      tpu.vector_store %arg11[%c0_45, %c0_46, %c0_47], %63 {strides = array<i32>} : memref<2x1x1xf32, #tpu.memory_space<vmem>>, vector<2x1x1xf32>,
    } else {
    }
    %c0 = arith.constant 0 : index
    %c0_1 = arith.constant 0 : index
    %c0_2 = arith.constant 0 : index
    %3 = vector.load %arg1[%c0, %c0_1, %c0_2] : memref<2x8x8xf32, #tpu.memory_space<vmem>>, vector<2x8x8xf32>
    %c0_3 = arith.constant 0 : index
    %c0_4 = arith.constant 0 : index
    %c0_5 = arith.constant 0 : index
    %4 = vector.load %arg2[%c0_3, %c0_4, %c0_5] : memref<2x8x1xi32, #tpu.memory_space<vmem>>, vector<2x8x1xi32>
    %cst = arith.constant dense<0xFF800000> : vector<2x8xf32>
    %5 = vector.multi_reduction <maximumf>, %3, %cst [2] : vector<2x8x8xf32> to vector<2x8xf32>
    %6 = vector.shape_cast %5 : vector<2x8xf32> to vector<2x8x1xf32>
    %7 = vector.broadcast %6 : vector<2x8x1xf32> to vector<2x8x8xf32>
    %8 = arith.subf %3, %7 : vector<2x8x8xf32>
    %9 = math.exp %8 : vector<2x8x8xf32>
    %cst_6 = arith.constant dense<0.000000e+00> : vector<2x8xf32>
    %10 = vector.multi_reduction <add>, %9, %cst_6 [2] : vector<2x8x8xf32> to vector<2x8xf32>
    %11 = vector.shape_cast %10 : vector<2x8xf32> to vector<2x8x1xf32>
    %12 = math.log %11 : vector<2x8x1xf32>
    %13 = arith.addf %12, %6 : vector<2x8x1xf32>
    %14 = tpu.iota {dimensions = array<i32: 2>} : vector<2x8x8xi32>
    %15 = vector.broadcast %4 : vector<2x8x1xi32> to vector<2x8x8xi32>
    %16 = arith.cmpi eq, %14, %15 : vector<2x8x8xi32>
    %cst_7 = arith.constant 0.000000e+00 : f32
    %17 = vector.broadcast %cst_7 : f32 to vector<2x8x8xf32>
    %18 = arith.select %16, %3, %17 : vector<2x8x8xi1>, vector<2x8x8xf32>
    %cst_8 = arith.constant dense<0.000000e+00> : vector<2x8xf32>
    %19 = vector.multi_reduction <add>, %18, %cst_8 [2] : vector<2x8x8xf32> to vector<2x8xf32>
    %20 = vector.shape_cast %19 : vector<2x8xf32> to vector<2x8x1xf32>
    %21 = arith.subf %13, %20 : vector<2x8x1xf32>
    %c8_i32 = arith.constant 8 : i32
    %22 = arith.muli %arg0, %c8_i32 : i32
    %23 = tpu.iota {dimensions = array<i32: 1>} : vector<2x8x1xi32>
    %24 = vector.broadcast %22 : i32 to vector<2x8x1xi32>
    %25 = arith.addi %24, %23 : vector<2x8x1xi32>
    %c8_i32_9 = arith.constant 8 : i32
    %26 = vector.broadcast %c8_i32_9 : i32 to vector<2x8x1xi32>
    %27 = arith.cmpi slt, %25, %26 : vector<2x8x1xi32>
    %c7_i32 = arith.constant 7 : i32
    %28 = vector.broadcast %c7_i32 : i32 to vector<2x8x1xi32>
    %29 = arith.cmpi eq, %4, %28 : vector<2x8x1xi32>
    %cst_10 = arith.constant 1.000000e-01 : f32
    %cst_11 = arith.constant 1.000000e+00 : f32
    %30 = vector.broadcast %cst_10 : f32 to vector<2x8x1xf32>
    %31 = vector.broadcast %cst_11 : f32 to vector<2x8x1xf32>
    %32 = arith.select %29, %30, %31 : vector<2x8x1xi1>, vector<2x8x1xf32>
    %cst_12 = arith.constant 0.000000e+00 : f32
    %33 = vector.broadcast %cst_12 : f32 to vector<2x8x1xf32>
    %34 = arith.select %27, %32, %33 : vector<2x8x1xi1>, vector<2x8x1xf32>
    %c0_13 = arith.constant 0 : index
    %c0_14 = arith.constant 0 : index
    %c0_15 = arith.constant 0 : index
    %35 = vector.load %arg9[%c0_13, %c0_14, %c0_15] : memref<2x1x1xf32, #tpu.memory_space<vmem>>, vector<2x1x1xf32>
    %36 = arith.mulf %34, %21 : vector<2x8x1xf32>
    %cst_16 = arith.constant dense<0.000000e+00> : vector<2x1xf32>
    %37 = vector.multi_reduction <add>, %36, %cst_16 [1] : vector<2x8x1xf32> to vector<2x1xf32>
    %38 = vector.shape_cast %37 : vector<2x1xf32> to vector<2x1x1xf32>
    %39 = arith.addf %35, %38 : vector<2x1x1xf32>
    %c0_17 = arith.constant 0 : index
    %c0_18 = arith.constant 0 : index
    %c0_19 = arith.constant 0 : index
    %40 = vector.load %arg9[%c0_17, %c0_18, %c0_19] : memref<2x1x1xf32, #tpu.memory_space<vmem>>, vector<2x1x1xf32>
    tpu.vector_store %arg9[%c0_17, %c0_18, %c0_19], %39 {strides = array<i32>} : memref<2x1x1xf32, #tpu.memory_space<vmem>>, vector<2x1x1xf32>,
    %c0_20 = arith.constant 0 : index
    %c0_21 = arith.constant 0 : index
    %c0_22 = arith.constant 0 : index
    %41 = vector.load %arg10[%c0_20, %c0_21, %c0_22] : memref<2x1x1xf32, #tpu.memory_space<vmem>>, vector<2x1x1xf32>
    %cst_23 = arith.constant dense<0.000000e+00> : vector<2x1xf32>
    %42 = vector.multi_reduction <add>, %34, %cst_23 [1] : vector<2x8x1xf32> to vector<2x1xf32>
    %43 = vector.shape_cast %42 : vector<2x1xf32> to vector<2x1x1xf32>
    %44 = arith.addf %41, %43 : vector<2x1x1xf32>
    %c0_24 = arith.constant 0 : index
    %c0_25 = arith.constant 0 : index
    %c0_26 = arith.constant 0 : index
    %45 = vector.load %arg10[%c0_24, %c0_25, %c0_26] : memref<2x1x1xf32, #tpu.memory_space<vmem>>, vector<2x1x1xf32>
    tpu.vector_store %arg10[%c0_24, %c0_25, %c0_26], %44 {strides = array<i32>} : memref<2x1x1xf32, #tpu.memory_space<vmem>>, vector<2x1x1xf32>,
    %46 = vector.extract_strided_slice %3 {offsets = [0, 0, 7], sizes = [2, 8, 1], strides = [1, 1, 1]} : vector<2x8x8xf32> to vector<2x8x1xf32>
    %47 = arith.cmpf ogt, %6, %46 : vector<2x8x1xf32>
    %48 = arith.andi %47, %27 : vector<2x8x1xi1>
    %49 = arith.extui %48 : vector<2x8x1xi1> to vector<2x8x1xi32>
    %50 = arith.sitofp %49 : vector<2x8x1xi32> to vector<2x8x1xf32>
    %c0_27 = arith.constant 0 : index
    %c0_28 = arith.constant 0 : index
    %c0_29 = arith.constant 0 : index
    %51 = vector.load %arg11[%c0_27, %c0_28, %c0_29] : memref<2x1x1xf32, #tpu.memory_space<vmem>>, vector<2x1x1xf32>
    %cst_30 = arith.constant dense<0.000000e+00> : vector<2x1xf32>
    %52 = vector.multi_reduction <add>, %50, %cst_30 [1] : vector<2x8x1xf32> to vector<2x1xf32>
    %53 = vector.shape_cast %52 : vector<2x1xf32> to vector<2x1x1xf32>
    %54 = arith.addf %51, %53 : vector<2x1x1xf32>
    %c0_31 = arith.constant 0 : index
    %c0_32 = arith.constant 0 : index
    %c0_33 = arith.constant 0 : index
    %55 = vector.load %arg11[%c0_31, %c0_32, %c0_33] : memref<2x1x1xf32, #tpu.memory_space<vmem>>, vector<2x1x1xf32>
    tpu.vector_store %arg11[%c0_31, %c0_32, %c0_33], %54 {strides = array<i32>} : memref<2x1x1xf32, #tpu.memory_space<vmem>>, vector<2x1x1xf32>,
    %c0_i32_34 = arith.constant 0 : i32
    %56 = arith.cmpi eq, %arg0, %c0_i32_34 : i32
    %57 = arith.extui %56 : i1 to i32
    %c0_i32_35 = arith.constant 0 : i32
    %58 = arith.cmpi ne, %57, %c0_i32_35 : i32
    scf.if %58 {
      %c0_36 = arith.constant 0 : index
      %c0_37 = arith.constant 0 : index
      %c0_38 = arith.constant 0 : index
      %59 = vector.load %arg9[%c0_36, %c0_37, %c0_38] : memref<2x1x1xf32, #tpu.memory_space<vmem>>, vector<2x1x1xf32>
      %60 = vector.shape_cast %59 : vector<2x1x1xf32> to vector<1x2x1x1xf32>
      %cst_39 = arith.constant dense<0.000000e+00> : vector<1xf32>
      %61 = vector.multi_reduction <add>, %60, %cst_39 [1, 2, 3] : vector<1x2x1x1xf32> to vector<1xf32>
      %62 = vector.shape_cast %61 : vector<1xf32> to vector<1x1x1x1xf32>
      %63 = vector.extract %62[0, 0, 0, 0] : f32 from vector<1x1x1x1xf32>
      %64 = vector.broadcast %63 : f32 to vector<1x1x1xf32>
      %c0_40 = arith.constant 0 : index
      %c0_41 = arith.constant 0 : index
      %c0_42 = arith.constant 0 : index
      %65 = vector.load %arg10[%c0_40, %c0_41, %c0_42] : memref<2x1x1xf32, #tpu.memory_space<vmem>>, vector<2x1x1xf32>
      %66 = vector.shape_cast %65 : vector<2x1x1xf32> to vector<1x2x1x1xf32>
      %cst_43 = arith.constant dense<0.000000e+00> : vector<1xf32>
      %67 = vector.multi_reduction <add>, %66, %cst_43 [1, 2, 3] : vector<1x2x1x1xf32> to vector<1xf32>
      %68 = vector.shape_cast %67 : vector<1xf32> to vector<1x1x1x1xf32>
      %69 = vector.extract %68[0, 0, 0, 0] : f32 from vector<1x1x1x1xf32>
      %70 = vector.broadcast %69 : f32 to vector<1x1x1xf32>
      %cst_44 = arith.constant 9.99999996E-13 : f32
      %71 = vector.broadcast %cst_44 : f32 to vector<1x1x1xf32>
      %72 = arith.maximumf %70, %71 : vector<1x1x1xf32>
      %73 = arith.divf %64, %72 : vector<1x1x1xf32>
      %c0_45 = arith.constant 0 : index
      %c0_46 = arith.constant 0 : index
      %c0_47 = arith.constant 0 : index
      %74 = vector.load %arg11[%c0_45, %c0_46, %c0_47] : memref<2x1x1xf32, #tpu.memory_space<vmem>>, vector<2x1x1xf32>
      %c0_48 = arith.constant 0 : index
      %c0_49 = arith.constant 0 : index
      %c0_50 = arith.constant 0 : index
      %75 = vector.load %arg3[%c0_48, %c0_49, %c0_50] : memref<2x1x1xf32, #tpu.memory_space<vmem>>, vector<2x1x1xf32>
      %76 = arith.subf %74, %75 : vector<2x1x1xf32>
      %77 = math.absf %76 : vector<2x1x1xf32>
      %78 = vector.shape_cast %77 : vector<2x1x1xf32> to vector<1x2x1x1xf32>
      %cst_51 = arith.constant dense<0.000000e+00> : vector<1xf32>
      %79 = vector.multi_reduction <add>, %78, %cst_51 [1, 2, 3] : vector<1x2x1x1xf32> to vector<1xf32>
      %80 = vector.shape_cast %79 : vector<1xf32> to vector<1x1x1x1xf32>
      %81 = vector.extract %80[0, 0, 0, 0] : f32 from vector<1x1x1x1xf32>
      %82 = vector.broadcast %81 : f32 to vector<1x1x1xf32>
      %cst_52 = arith.constant 2.000000e+00 : f32
      %83 = vector.broadcast %cst_52 : f32 to vector<1x1x1xf32>
      %84 = arith.divf %82, %83 : vector<1x1x1xf32>
      %c0_53 = arith.constant 0 : index
      %85 = memref.load %arg7[%c0_53] : memref<1xf32, #tpu.memory_space<smem>>
      %c0_54 = arith.constant 0 : index
      %c0_55 = arith.constant 0 : index
      %c0_56 = arith.constant 0 : index
      %86 = vector.load %arg4[%c0_54, %c0_55, %c0_56] : memref<1x8x4xf32, #tpu.memory_space<vmem>>, vector<1x8x4xf32>
      %c0_57 = arith.constant 0 : index
      %c0_58 = arith.constant 0 : index
      %c0_59 = arith.constant 0 : index
      %87 = vector.load %arg5[%c0_57, %c0_58, %c0_59] : memref<1x8x4xf32, #tpu.memory_space<vmem>>, vector<1x8x4xf32>
      %c0_60 = arith.constant 0 : index
      %c0_61 = arith.constant 0 : index
      %c0_62 = arith.constant 0 : index
      %88 = vector.load %arg6[%c0_60, %c0_61, %c0_62] : memref<1x8x1xf32, #tpu.memory_space<vmem>>, vector<1x8x1xf32>
      %cst_63 = arith.constant 0.000000e+00 : f32
      %89 = vector.broadcast %cst_63 : f32 to vector<1x8x1xf32>
      %90 = arith.cmpf ogt, %88, %89 : vector<1x8x1xf32>
      %91 = arith.subf %86, %87 : vector<1x8x4xf32>
      %92 = math.absf %91 : vector<1x8x4xf32>
      %cst_64 = arith.constant 0.000000e+00 : f32
      %93 = vector.shape_cast %90 : vector<1x8x1xi1> to vector<1x8x1xi1>
      %94 = vector.broadcast %93 : vector<1x8x1xi1> to vector<1x8x4xi1>
      %95 = vector.broadcast %cst_64 : f32 to vector<1x8x4xf32>
      %96 = arith.select %94, %92, %95 : vector<1x8x4xi1>, vector<1x8x4xf32>
      %97 = vector.shape_cast %96 : vector<1x8x4xf32> to vector<1x1x8x4xf32>
      %cst_65 = arith.constant dense<0.000000e+00> : vector<1xf32>
      %98 = vector.multi_reduction <add>, %97, %cst_65 [1, 2, 3] : vector<1x1x8x4xf32> to vector<1xf32>
      %99 = vector.shape_cast %98 : vector<1xf32> to vector<1x1x1x1xf32>
      %100 = vector.extract %99[0, 0, 0, 0] : f32 from vector<1x1x1x1xf32>
      %101 = vector.broadcast %100 : f32 to vector<1x1x1xf32>
      %102 = vector.broadcast %85 : f32 to vector<1x1x1xf32>
      %103 = arith.divf %101, %102 : vector<1x1x1xf32>
      %104 = vector.extract_strided_slice %86 {offsets = [0, 0, 0], sizes = [1, 8, 2], strides = [1, 1, 1]} : vector<1x8x4xf32> to vector<1x8x2xf32>
      %105 = vector.extract_strided_slice %86 {offsets = [0, 0, 2], sizes = [1, 8, 2], strides = [1, 1, 1]} : vector<1x8x4xf32> to vector<1x8x2xf32>
      %cst_66 = arith.constant 5.000000e-01 : f32
      %106 = vector.broadcast %cst_66 : f32 to vector<1x8x2xf32>
      %107 = arith.mulf %106, %105 : vector<1x8x2xf32>
      %108 = arith.subf %104, %107 : vector<1x8x2xf32>
      %cst_67 = arith.constant 5.000000e-01 : f32
      %109 = vector.broadcast %cst_67 : f32 to vector<1x8x2xf32>
      %110 = arith.mulf %109, %105 : vector<1x8x2xf32>
      %111 = arith.addf %104, %110 : vector<1x8x2xf32>
      %112 = vector.extract_strided_slice %87 {offsets = [0, 0, 0], sizes = [1, 8, 2], strides = [1, 1, 1]} : vector<1x8x4xf32> to vector<1x8x2xf32>
      %113 = vector.extract_strided_slice %87 {offsets = [0, 0, 2], sizes = [1, 8, 2], strides = [1, 1, 1]} : vector<1x8x4xf32> to vector<1x8x2xf32>
      %cst_68 = arith.constant 5.000000e-01 : f32
      %114 = vector.broadcast %cst_68 : f32 to vector<1x8x2xf32>
      %115 = arith.mulf %114, %113 : vector<1x8x2xf32>
      %116 = arith.subf %112, %115 : vector<1x8x2xf32>
      %cst_69 = arith.constant 5.000000e-01 : f32
      %117 = vector.broadcast %cst_69 : f32 to vector<1x8x2xf32>
      %118 = arith.mulf %117, %113 : vector<1x8x2xf32>
      %119 = arith.addf %112, %118 : vector<1x8x2xf32>
      %120 = arith.subf %111, %108 : vector<1x8x2xf32>
      %121 = vector.extract_strided_slice %120 {offsets = [0, 0, 0], sizes = [1, 8, 1], strides = [1, 1, 1]} : vector<1x8x2xf32> to vector<1x8x1xf32>
      %122 = vector.extract_strided_slice %120 {offsets = [0, 0, 1], sizes = [1, 8, 1], strides = [1, 1, 1]} : vector<1x8x2xf32> to vector<1x8x1xf32>
      %123 = arith.mulf %121, %122 : vector<1x8x1xf32>
      %124 = arith.subf %119, %116 : vector<1x8x2xf32>
      %125 = vector.extract_strided_slice %124 {offsets = [0, 0, 0], sizes = [1, 8, 1], strides = [1, 1, 1]} : vector<1x8x2xf32> to vector<1x8x1xf32>
      %126 = vector.extract_strided_slice %124 {offsets = [0, 0, 1], sizes = [1, 8, 1], strides = [1, 1, 1]} : vector<1x8x2xf32> to vector<1x8x1xf32>
      %127 = arith.mulf %125, %126 : vector<1x8x1xf32>
      %128 = arith.minimumf %111, %119 : vector<1x8x2xf32>
      %129 = arith.maximumf %108, %116 : vector<1x8x2xf32>
      %130 = arith.subf %128, %129 : vector<1x8x2xf32>
      %cst_70 = arith.constant 0.000000e+00 : f32
      %131 = vector.broadcast %cst_70 : f32 to vector<1x8x2xf32>
      %132 = arith.maximumf %130, %131 : vector<1x8x2xf32>
      %133 = vector.extract_strided_slice %132 {offsets = [0, 0, 0], sizes = [1, 8, 1], strides = [1, 1, 1]} : vector<1x8x2xf32> to vector<1x8x1xf32>
      %134 = vector.extract_strided_slice %132 {offsets = [0, 0, 1], sizes = [1, 8, 1], strides = [1, 1, 1]} : vector<1x8x2xf32> to vector<1x8x1xf32>
      %135 = arith.mulf %133, %134 : vector<1x8x1xf32>
      %136 = arith.maximumf %111, %119 : vector<1x8x2xf32>
      %137 = arith.minimumf %108, %116 : vector<1x8x2xf32>
      %138 = arith.subf %136, %137 : vector<1x8x2xf32>
      %cst_71 = arith.constant 0.000000e+00 : f32
      %139 = vector.broadcast %cst_71 : f32 to vector<1x8x2xf32>
      %140 = arith.maximumf %138, %139 : vector<1x8x2xf32>
      %141 = vector.extract_strided_slice %140 {offsets = [0, 0, 0], sizes = [1, 8, 1], strides = [1, 1, 1]} : vector<1x8x2xf32> to vector<1x8x1xf32>
      %142 = vector.extract_strided_slice %140 {offsets = [0, 0, 1], sizes = [1, 8, 1], strides = [1, 1, 1]} : vector<1x8x2xf32> to vector<1x8x1xf32>
      %143 = arith.mulf %141, %142 : vector<1x8x1xf32>
      %144 = arith.addf %123, %127 : vector<1x8x1xf32>
      %145 = arith.subf %144, %135 : vector<1x8x1xf32>
      %cst_72 = arith.constant 0.000000e+00 : f32
      %146 = vector.broadcast %cst_72 : f32 to vector<1x8x1xf32>
      %147 = arith.cmpf ogt, %88, %146 : vector<1x8x1xf32>
      %cst_73 = arith.constant 1.000000e+00 : f32
      %148 = vector.broadcast %cst_73 : f32 to vector<1x8x1xf32>
      %149 = arith.select %147, %145, %148 : vector<1x8x1xi1>, vector<1x8x1xf32>
      %cst_74 = arith.constant 0.000000e+00 : f32
      %150 = vector.broadcast %cst_74 : f32 to vector<1x8x1xf32>
      %151 = arith.cmpf ogt, %88, %150 : vector<1x8x1xf32>
      %cst_75 = arith.constant 1.000000e+00 : f32
      %152 = vector.broadcast %cst_75 : f32 to vector<1x8x1xf32>
      %153 = arith.select %151, %143, %152 : vector<1x8x1xi1>, vector<1x8x1xf32>
      %154 = arith.divf %135, %149 : vector<1x8x1xf32>
      %155 = arith.subf %153, %149 : vector<1x8x1xf32>
      %156 = arith.divf %155, %153 : vector<1x8x1xf32>
      %157 = arith.subf %154, %156 : vector<1x8x1xf32>
      %cst_76 = arith.constant 0.000000e+00 : f32
      %158 = vector.broadcast %cst_76 : f32 to vector<1x8x1xf32>
      %159 = arith.cmpf ogt, %88, %158 : vector<1x8x1xf32>
      %cst_77 = arith.constant 1.000000e+00 : f32
      %160 = vector.broadcast %cst_77 : f32 to vector<1x8x1xf32>
      %161 = arith.subf %160, %157 : vector<1x8x1xf32>
      %cst_78 = arith.constant 0.000000e+00 : f32
      %162 = vector.broadcast %cst_78 : f32 to vector<1x8x1xf32>
      %163 = arith.select %159, %161, %162 : vector<1x8x1xi1>, vector<1x8x1xf32>
      %164 = vector.shape_cast %163 : vector<1x8x1xf32> to vector<1x1x8x1xf32>
      %cst_79 = arith.constant dense<0.000000e+00> : vector<1xf32>
      %165 = vector.multi_reduction <add>, %164, %cst_79 [1, 2, 3] : vector<1x1x8x1xf32> to vector<1xf32>
      %166 = vector.shape_cast %165 : vector<1xf32> to vector<1x1x1x1xf32>
      %167 = vector.extract %166[0, 0, 0, 0] : f32 from vector<1x1x1x1xf32>
      %168 = vector.broadcast %167 : f32 to vector<1x1x1xf32>
      %169 = vector.broadcast %85 : f32 to vector<1x1x1xf32>
      %170 = arith.divf %168, %169 : vector<1x1x1xf32>
      %171 = tpu.iota {dimensions = array<i32: 2>} : vector<1x1x128xi32>
      %c0_i32_80 = arith.constant 0 : i32
      %172 = vector.broadcast %c0_i32_80 : i32 to vector<1x1x128xi32>
      %173 = arith.cmpi eq, %171, %172 : vector<1x1x128xi32>
      %cst_81 = arith.constant 0.000000e+00 : f32
      %174 = vector.shape_cast %73 : vector<1x1x1xf32> to vector<1x1x1xf32>
      %175 = vector.broadcast %174 : vector<1x1x1xf32> to vector<1x1x128xf32>
      %176 = vector.broadcast %cst_81 : f32 to vector<1x1x128xf32>
      %177 = arith.select %173, %175, %176 : vector<1x1x128xi1>, vector<1x1x128xf32>
      %c1_i32 = arith.constant 1 : i32
      %178 = vector.broadcast %c1_i32 : i32 to vector<1x1x128xi32>
      %179 = arith.cmpi eq, %171, %178 : vector<1x1x128xi32>
      %cst_82 = arith.constant 0.000000e+00 : f32
      %180 = vector.shape_cast %84 : vector<1x1x1xf32> to vector<1x1x1xf32>
      %181 = vector.broadcast %180 : vector<1x1x1xf32> to vector<1x1x128xf32>
      %182 = vector.broadcast %cst_82 : f32 to vector<1x1x128xf32>
      %183 = arith.select %179, %181, %182 : vector<1x1x128xi1>, vector<1x1x128xf32>
      %184 = arith.addf %177, %183 : vector<1x1x128xf32>
      %c2_i32 = arith.constant 2 : i32
      %185 = vector.broadcast %c2_i32 : i32 to vector<1x1x128xi32>
      %186 = arith.cmpi eq, %171, %185 : vector<1x1x128xi32>
      %cst_83 = arith.constant 0.000000e+00 : f32
      %187 = vector.shape_cast %103 : vector<1x1x1xf32> to vector<1x1x1xf32>
      %188 = vector.broadcast %187 : vector<1x1x1xf32> to vector<1x1x128xf32>
      %189 = vector.broadcast %cst_83 : f32 to vector<1x1x128xf32>
      %190 = arith.select %186, %188, %189 : vector<1x1x128xi1>, vector<1x1x128xf32>
      %191 = arith.addf %184, %190 : vector<1x1x128xf32>
      %c3_i32 = arith.constant 3 : i32
      %192 = vector.broadcast %c3_i32 : i32 to vector<1x1x128xi32>
      %193 = arith.cmpi eq, %171, %192 : vector<1x1x128xi32>
      %cst_84 = arith.constant 0.000000e+00 : f32
      %194 = vector.shape_cast %170 : vector<1x1x1xf32> to vector<1x1x1xf32>
      %195 = vector.broadcast %194 : vector<1x1x1xf32> to vector<1x1x128xf32>
      %196 = vector.broadcast %cst_84 : f32 to vector<1x1x128xf32>
      %197 = arith.select %193, %195, %196 : vector<1x1x128xi1>, vector<1x1x128xf32>
      %198 = arith.addf %191, %197 : vector<1x1x128xf32>
      %c0_85 = arith.constant 0 : index
      %c0_86 = arith.constant 0 : index
      %c0_87 = arith.constant 0 : index
      %199 = vector.load %arg8[%c0_85, %c0_86, %c0_87] : memref<1x1x128xf32, #tpu.memory_space<vmem>>, vector<1x1x128xf32>
      tpu.vector_store %arg8[%c0_85, %c0_86, %c0_87], %198 {strides = array<i32>} : memref<1x1x128xf32, #tpu.memory_space<vmem>>, vector<1x1x128xf32>,
    } else {
    }
    return
  }
  func.func @transform_0(%arg0: i32) -> (i32, i32, i32) {
    %c0_i32 = arith.constant 0 : i32
    %c0_i32_0 = arith.constant 0 : i32
    %c0_i32_1 = arith.constant 0 : i32
    return %c0_i32, %arg0, %c0_i32_0 : i32, i32, i32
  }
  func.func @transform_1(%arg0: i32) -> (i32, i32, i32) {
    %c0_i32 = arith.constant 0 : i32
    %c0_i32_0 = arith.constant 0 : i32
    %c0_i32_1 = arith.constant 0 : i32
    return %c0_i32, %arg0, %c0_i32_0 : i32, i32, i32
  }
  func.func @transform_2(%arg0: i32) -> (i32, i32, i32) {
    %c0_i32 = arith.constant 0 : i32
    %c0_i32_0 = arith.constant 0 : i32
    %c0_i32_1 = arith.constant 0 : i32
    %c0_i32_2 = arith.constant 0 : i32
    return %c0_i32, %c0_i32_0, %c0_i32_1 : i32, i32, i32
  }
  func.func @transform_3(%arg0: i32) -> (i32, i32, i32) {
    %c0_i32 = arith.constant 0 : i32
    %c0_i32_0 = arith.constant 0 : i32
    %c0_i32_1 = arith.constant 0 : i32
    %c0_i32_2 = arith.constant 0 : i32
    return %c0_i32, %c0_i32_0, %c0_i32_1 : i32, i32, i32
  }
  func.func @transform_4(%arg0: i32) -> (i32, i32, i32) {
    %c0_i32 = arith.constant 0 : i32
    %c0_i32_0 = arith.constant 0 : i32
    %c0_i32_1 = arith.constant 0 : i32
    %c0_i32_2 = arith.constant 0 : i32
    return %c0_i32, %c0_i32_0, %c0_i32_1 : i32, i32, i32
  }
  func.func @transform_5(%arg0: i32) -> (i32, i32, i32) {
    %c0_i32 = arith.constant 0 : i32
    %c0_i32_0 = arith.constant 0 : i32
    %c0_i32_1 = arith.constant 0 : i32
    %c0_i32_2 = arith.constant 0 : i32
    return %c0_i32, %c0_i32_0, %c0_i32_1 : i32, i32, i32
  }
  func.func @transform_6(%arg0: i32) -> i32 {
    %c0_i32 = arith.constant 0 : i32
    %c0_i32_0 = arith.constant 0 : i32
    return %c0_i32 : i32
  }
  func.func @transform_7(%arg0: i32) -> (i32, i32, i32) {
    %c0_i32 = arith.constant 0 : i32
    %c0_i32_0 = arith.constant 0 : i32
    %c0_i32_1 = arith.constant 0 : i32
    %c0_i32_2 = arith.constant 0 : i32
    return %c0_i32, %c0_i32_0, %c0_i32_1 : i32, i32, i32
  }
}

</mosaic_0001>

<bundles_post_ra>
// kernel: tpu_custom_call.1
= control target key start
LH: loop header
LB: loop body
LE: loop exit
PB: predicated region body
PF: predicated region fallthrough
CT: control target
= control target key end

     0   :  { %13 = vsyncpa [#allocation7], 0  ;;  %s941_s0 = inlined_call_operand.hbm [shape: f32[2,8,8], index: 0, kind: input, shape index: {}]   ;;  %s942_s1 = inlined_call_operand.hbm [shape: s32[2,8,1], index: 1, kind: input, shape index: {}]   ;;  %s943_s2 = inlined_call_operand.hbm [shape: f32[2,1,1], index: 2, kind: input, shape index: {}]   ;;  %s944_s3 = inlined_call_operand.hbm [shape: f32[1,8,4], index: 3, kind: input, shape index: {}]   ;;  %s945_s4 = inlined_call_operand.hbm [shape: f32[1,8,4], index: 4, kind: input, shape index: {}]   ;;  %s946_s5 = inlined_call_operand.hbm [shape: f32[1,8,1], index: 5, kind: input, shape index: {}]   ;;  %s947_s6 = inlined_call_operand.<no memory space> [shape: f32[1], index: 6, kind: input, shape index: {}]   ;;  %s948_s7 = inlined_call_operand.hbm [shape: f32[1,1,128], index: 7, kind: output, shape index: {}]  }
   0x1   :  { %14 = vsyncpa [#allocation10], 0 }
   0x2   :  { %15 = vsyncpa [#allocation13], 0 }
   0x3   :  { %16 = vsyncpa [#allocation16], 0 }
   0x4   :  { %17 = vsyncpa [#allocation8], 0  ;;  %s682_s24 = smov [#allocation9]   ;;  %s683_s26 = smov [#allocation12]  }
   0x5   :  { %s35_s25 = sshll.u32 %s682_s24, 4  ;;  %s60_s27 = sshll.u32 %s683_s26, 4  ;;  %s36_s25 = int_to_ptr.vmem [resolvable:$true] %s35_s25  ;;  %s61_s27 = int_to_ptr.vmem [resolvable:$true] %s60_s27 }
   0x6   :  { %s518_s30 = scalar_lea.hbm %s942_s1, 256 }
   0x7   :  { %p519_p0 = scmp.ne.s32.totalorder %s942_s1, %s518_s30  ;;  %p522_p1 = scmp.lt.u32.totalorder %s518_s30, %s942_s1 }
   0x9   :  { %p524_p2 = pnand %p522_p1, %p519_p0 }
   0xb   :  { %527 = shalt.err (!%p524_p2)
}
   0xc   :  { %s528_s12 = scalar_lea.vmem %s36_s25, 256  ;;  %p533_p4 = scmp.lt.s32.totalorder %s36_s25, %s36_s25 }
   0xd   :  { %p529_p3 = scmp.ne.s32.totalorder %s36_s25, %s528_s12  ;;  %p534_p5 = scmp.lt.s32.totalorder %s528_s12, %s528_s12 }
   0xf   :  { %p535_p6 = por %p534_p5, %p533_p4 }
  0x11   :  { %p536_p7 = pnand %p535_p6, %p529_p3 }
  0x13   :  { %539 = shalt.err (!%p536_p7)
}
  0x14   :  { %s684_s13 = smov 128   ;;  %s685_s14 = smov 8  }
  0x15   :  { %41 = dma.hbm_to_vmem [thread:$0]  %s942_s1, 256, %s36_s25, [#allocation10], %s684_s13, %s684_s13, %s685_s14  }
  0x16   :  { %s540_s19 = scalar_lea.hbm %s944_s3, 128 }
  0x17   :  { %p541_p8 = scmp.ne.s32.totalorder %s944_s3, %s540_s19  ;;  %p544_p9 = scmp.lt.u32.totalorder %s540_s19, %s944_s3 }
  0x19   :  { %p546_p10 = pnand %p544_p9, %p541_p8 }
  0x1b   :  { %549 = shalt.err (!%p546_p10)
}
  0x1c   :  { %s550_s24 = scalar_lea.vmem %s61_s27, 128  ;;  %p555_p12 = scmp.lt.s32.totalorder %s61_s27, %s61_s27 }
  0x1d   :  { %p551_p11 = scmp.ne.s32.totalorder %s61_s27, %s550_s24  ;;  %p556_p13 = scmp.lt.s32.totalorder %s550_s24, %s550_s24 }
  0x1f   :  { %p557_p0 = por %p556_p13, %p555_p12 }
  0x21   :  { %p558_p1 = pnand %p557_p0, %p551_p11 }
  0x23   :  { %561 = shalt.err (!%p558_p1)
}
  0x24   :  { %63 = dma.hbm_to_vmem [thread:$0]  %s944_s3, 128, %s61_s27, [#allocation13]  }
  0x25   :  { %s686_s26 = smov [#allocation6]   ;;  %s687_s29 = smov [#allocation11]  }
  0x26   :  { %s23_s28 = sshll.u32 %s686_s26, 4  ;;  %s47_s30 = sshll.u32 %s687_s29, 4  ;;  %s24_s28 = int_to_ptr.vmem [resolvable:$true] %s23_s28  ;;  %s767_s30 = int_to_ptr.vmem [resolvable:$true] %s47_s30 }
  0x27   :  { %s562_s10 = scalar_lea.hbm %s941_s0, 256 }
  0x28   :  { %p563_p2 = scmp.ne.s32.totalorder %s941_s0, %s562_s10  ;;  %p566_p3 = scmp.lt.u32.totalorder %s562_s10, %s941_s0 }
  0x2a   :  { %p568_p4 = pnand %p566_p3, %p563_p2 }
  0x2c   :  { %571 = shalt.err (!%p568_p4)
}
  0x2d   :  { %s572_s3 = scalar_lea.vmem %s24_s28, 256  ;;  %p577_p6 = scmp.lt.s32.totalorder %s24_s28, %s24_s28 }
  0x2e   :  { %p573_p5 = scmp.ne.s32.totalorder %s24_s28, %s572_s3  ;;  %p578_p7 = scmp.lt.s32.totalorder %s572_s3, %s572_s3 }
  0x30   :  { %p579_p8 = por %p578_p7, %p577_p6 }
  0x32   :  { %p580_p9 = pnand %p579_p8, %p573_p5 }
  0x34   :  { %583 = shalt.err (!%p580_p9)
}
  0x35   :  { %29 = dma.hbm_to_vmem [thread:$0]  %s941_s0, 256, %s24_s28, [#allocation7], %s684_s13, %s684_s13, %s685_s14  }
  0x36   :  { %s584_s20 = scalar_lea.hbm %s943_s2, 32 }
  0x37   :  { %p585_p10 = scmp.ne.s32.totalorder %s943_s2, %s584_s20  ;;  %p588_p11 = scmp.lt.u32.totalorder %s584_s20, %s943_s2 }
  0x39   :  { %p590_p12 = pnand %p588_p11, %p585_p10 }
  0x3b   :  { %593 = shalt.err (!%p590_p12)
}
  0x3c   :  { %s594_s1 = scalar_lea.vmem %s767_s30, 32  ;;  %p599_p0 = scmp.lt.s32.totalorder %s767_s30, %s767_s30 }
  0x3d   :  { %p595_p13 = scmp.ne.s32.totalorder %s767_s30, %s594_s1  ;;  %p600_p1 = scmp.lt.s32.totalorder %s594_s1, %s594_s1 }
  0x3f   :  { %p601_p2 = por %p600_p1, %p599_p0 }
  0x41   :  { %p602_p3 = pnand %p601_p2, %p595_p13 }
  0x43   :  { %605 = shalt.err (!%p602_p3)
}
  0x44   :  { %s688_s0 = smov 16   ;;  %s689_s13 = smov 1  }
  0x45   :  { %53 = dma.hbm_to_vmem [thread:$0]  %s943_s2, 32, %s767_s30, [#allocation10], %s688_s0, %s688_s0, %s689_s13  }
  0x46   :  { %s690_s26 = smov [#allocation14]   ;;  %s691_s29 = smov [#allocation15]  }
  0x47   :  { %s70_s28 = sshll.u32 %s690_s26, 4  ;;  %s80_s8 = sshll.u32 %s691_s29, 4  ;;  %s71_s28 = int_to_ptr.vmem [resolvable:$true] %s70_s28  ;;  %s81_s8 = int_to_ptr.vmem [resolvable:$true] %s80_s8 }
  0x48   :  { %s606_s11 = scalar_lea.hbm %s945_s4, 128 }
  0x49   :  { %p607_p4 = scmp.ne.s32.totalorder %s945_s4, %s606_s11  ;;  %p610_p5 = scmp.lt.u32.totalorder %s606_s11, %s945_s4 }
  0x4b   :  { %p612_p6 = pnand %p610_p5, %p607_p4 }
  0x4d   :  { %615 = shalt.err (!%p612_p6)
}
  0x4e   :  { %s616_s2 = scalar_lea.vmem %s71_s28, 128  ;;  %p621_p8 = scmp.lt.s32.totalorder %s71_s28, %s71_s28 }
  0x4f   :  { %p617_p7 = scmp.ne.s32.totalorder %s71_s28, %s616_s2  ;;  %p622_p9 = scmp.lt.s32.totalorder %s616_s2, %s616_s2 }
  0x51   :  { %p623_p10 = por %p622_p9, %p621_p8 }
  0x53   :  { %p624_p11 = pnand %p623_p10, %p617_p7 }
  0x55   :  { %627 = shalt.err (!%p624_p11)
}
  0x56   :  { %73 = dma.hbm_to_vmem [thread:$0]  %s945_s4, 128, %s71_s28, [#allocation13]  }
  0x57   :  { %s628_s19 = scalar_lea.hbm %s946_s5, 128 }
  0x58   :  { %p629_p12 = scmp.ne.s32.totalorder %s946_s5, %s628_s19  ;;  %p632_p13 = scmp.lt.u32.totalorder %s628_s19, %s946_s5 }
  0x5a   :  { %p634_p0 = pnand %p632_p13, %p629_p12 }
  0x5c   :  { %637 = shalt.err (!%p634_p0)
}
  0x5d   :  { %s638_s24 = scalar_lea.vmem %s81_s8, 128  ;;  %p643_p2 = scmp.lt.s32.totalorder %s81_s8, %s81_s8 }
  0x5e   :  { %p639_p1 = scmp.ne.s32.totalorder %s81_s8, %s638_s24  ;;  %p644_p3 = scmp.lt.s32.totalorder %s638_s24, %s638_s24 }
  0x60   :  { %p645_p4 = por %p644_p3, %p643_p2 }
  0x62   :  { %p646_p5 = pnand %p645_p4, %p639_p1 }
  0x64   :  { %649 = shalt.err (!%p646_p5)
}
  0x65   :  { %83 = dma.hbm_to_vmem [thread:$0]  %s946_s5, 128, %s81_s8, [#allocation16]  }
  0x66   :  { %672 = dma.done.wait [#allocation7], 256  }
  0x67   :  { %673 = vsyncadd [#allocation7], 4294967040 }
  0x68   :  { %674 = dma.done.wait [#allocation10], 288  }
  0x69   :  { %675 = vsyncadd [#allocation10], 4294967008 }
  0x6a   :  { %676 = dma.done.wait [#allocation13], 256  }
  0x6b   :  { %677 = vsyncadd [#allocation13], 4294967040 }
  0x6c   :  { %678 = dma.done.wait [#allocation16], 128  }
  0x6d   :  { %679 = vsyncadd [#allocation16], 4294967168  ;;  %vm108_vm0 = vcmask 0   ;;  %v692_v0 = vmov 0   ;;  %v693_v1 = vmov 0.0   ;;  %vm119_vm1 = vcmask 64512  }
  0x6e   :  { %500 = vset.pattern.permute.xlu1 %v692_v0  ;;  %111 = vst.msk [vmem:[#allocation3] sm:$0x1] %vm108_vm0, %v693_v1  ;;  %109 = vst.msk [vmem:[#allocation2] sm:$0x1] %vm108_vm0, %v693_v1  ;;  %501 = vset.pattern.permute.xlu0 %v692_v0  ;;  %v115_v2 = vld [vmem:[#allocation6] sm:$0xff]  ;;  %v116_v3 = vld [vmem:[#allocation6 + $0x8] sm:$0xff]  ;;  %v144_v28 = vlaneseq }
  0x6f   :  { %110 = vst.msk [vmem:[#allocation2 + $0x1] sm:$0x1] %vm108_vm0, %v693_v1  ;;  %112 = vst.msk [vmem:[#allocation3 + $0x1] sm:$0x1] %vm108_vm0, %v693_v1  ;;  %v117_v4 = vld [vmem:[#allocation9] sm:$0xff]  ;;  %vm180_vm2 = vcmask 7168  }
  0x70   :  { %113 = vst.msk [vmem:[#allocation4] sm:$0x1] %vm108_vm0, %v693_v1  ;;  %114 = vst.msk [vmem:[#allocation4 + $0x1] sm:$0x1] %vm108_vm0, %v693_v1  ;;  %v120_v5 = vsel %vm119_vm1, %v115_v2, -inf  ;;  %147 = vperm.xlu1 %500, %v117_v4   ;;  %vm170_vm3 = vcmp.eq.s32.totalorder %v117_v4, 7 }
  0x71   :  { %121 = vmax.xlane.f32.xlu0 %v120_v5  ;;  %v694_v6 = vmov 1.0   ;;  %v843_v8 = vld [vmem:[#allocation9 + $0x8] sm:$0xff]  ;;  %v845_v9 = vld [vmem:[#allocation14] sm:$0xff]  ;;  %v123_v10 = vsel %vm119_vm1, %v116_v3, -inf  ;;  %s695_s5 = smov 126   ;;  %v853_v21 = vld [vmem:[#allocation12] sm:$0xff] }
  0x72   :  { %v841_v7 = vsel %vm170_vm3, 0.1, %v694_v6  ;;  %v379_v13 = vmul.f32 0.5, %v845_v9  ;;  %v372_v22 = vmul.f32 0.5, %v853_v21  ;;  %v863_v31 = vand.u32 127, %v144_v28  ;;  %s697_s0 = smov 127  }
  0x73   :  { %v202_v11 = vsel %vm180_vm2, %v841_v7, 0.0  ;;  %vm230_vm6 = vcmask 64568   ;;  %v696_v57 = vmov 1966171168   ;;  %vm171_vm9 = vcmp.eq.s32.totalorder %v843_v8, 7  ;;  %s698_s13 = smov 121  }
  0x74   :  { %v203_v12 = vrot.slane %v202_v11, 4  ;;  %150 = vperm.xlu1 %500, %v843_v8   ;;  %v248_v58 = vunpack.c.l.s4 %v696_v57  ;;  %vm357_vm12 = vcmask 31744   ;;  %vm440_vm13 = vcmp.eq.s32.totalorder %v863_v31, 0 }
  0x75   :  { %124 = vmax.xlane.f32.xlu0 %v123_v10  ;;  %v200_v18 = vld [vmem:[#allocation3] sm:$0x1]  ;;  %vm442_vm14 = vcmp.eq.s32.totalorder %v863_v31, 1  ;;  %vm445_vm15 = vcmp.eq.s32.totalorder %v863_v31, 2 }
  0x76   :  { %v204_v14 = vadd.f32 %v203_v12, %v202_v11  ;;  %v249_v63 = vunpack.c.0.s8 %v248_v58 }
  0x78   :  { %v205_v15 = vrot.slane %v204_v14, 2  ;;  %381 = vrot.lane.b32.xlu1 %v379_v13, %s695_s5 }
  0x7a   :  { %v206_v16 = vadd.f32 %v205_v15, %v204_v14 }
  0x7c   :  { %v207_v17 = vrot.slane %v206_v16, 1 }
  0x7e   :  { %v208_v19 = vadd.f32 %v207_v17, %v206_v16 }
  0x80   :  { %v216_v20 = vadd.f32 %v208_v19, %v200_v18  ;;  %v885_v18 = vsel %vm171_vm9, 0.1, %v694_v6 }
  0x81   :  { %v209_v19 = vsel %vm180_vm2, %v885_v18, 0.0 }
  0x82   :  { %218 = vst.msk [vmem:[#allocation3] sm:$0x1] %vm108_vm0, %v216_v20 }
  0x8b   :  { %374 = vrot.lane.b32.xlu0 %v372_v22, %s695_s5  ;;  %v210_v22 = vrot.slane %v209_v19, 4 }
  0xef   :  { %v148_v30 = vpop.permute.xlu1 %147 }
  0xf0   :  { %vm152_vm5 = vcmp.eq.s32.totalorder %v863_v31, %v148_v30 }
  0xf1   :  { %v154_v36 = vsel %vm152_vm5, %v115_v2, 0.0 }
  0xf2   :  { %v156_v40 = vsel %vm119_vm1, %v154_v36, 0.0 }
  0xf3   :  { %v151_v33 = vpop.permute.xlu1 %150 }
  0xf4   :  { %vm153_vm8 = vcmp.eq.s32.totalorder %v863_v31, %v151_v33 }
  0xf5   :  { %v155_v42 = vsel %vm153_vm8, %v116_v3, 0.0 }
  0xf6   :  { %v159_v46 = vsel %vm119_vm1, %v155_v42, 0.0 }
  0xf7   :  { %v382_v49 = vpop.permute.xlu1 %381 }
  0xf8   :  { %v384_v53 = vsub.f32 %v845_v9, %v382_v49  ;;  %v385_v54 = vadd.f32 %v382_v49, %v845_v9 }
  0xfa   :  { %v392_v12 = vsub.f32 %v385_v54, %v384_v53 }
  0xfe   :  { %v856_v23 = vpop.xlane.xlu0 %121 }
  0xff   :  { %v126_v24 = vsub.f32 %v115_v2, %v856_v23  ;;  %vm220_vm7 = vcmp.gt.f32.partialorder %v856_v23, %v115_v2 }
 0x100   :  { %v470_v39 = vsel %vm220_vm7, 1.0, %v693_v1 }
 0x101   :  { %v128_v25 = vmul.f32 1.442695, %v126_v24  ;;  %v231_v44 = vsel %vm230_vm6, %v470_v39, 0.0 }
 0x102   :  { %v859_v26 = vpop.xlane.xlu0 %124  ;;  %v232_v47 = vrot.slane %v231_v44, 4 }
 0x103   :  { %502 = vpow2.f32 %v128_v25  ;;  %v127_v27 = vsub.f32 %v116_v3, %v859_v26  ;;  %vm221_vm4 = vcmp.gt.f32.partialorder %v859_v26, %v116_v3  ;;  %v211_v25 = vadd.f32 %v210_v22, %v209_v19 }
 0x104   :  { %v471_v32 = vsel %vm221_vm4, 1.0, %v693_v1  ;;  %v233_v51 = vadd.f32 %v232_v47, %v231_v44  ;;  %v251_v1 = vshrl.u32 %v144_v28, 7 }
 0x105   :  { %v130_v29 = vmul.f32 1.442695, %v127_v27  ;;  %v238_v34 = vsel %vm230_vm6, %v471_v32, 0.0  ;;  %v212_v28 = vrot.slane %v211_v25, 2 }
 0x106   :  { %v239_v38 = vrot.slane %v238_v34, 4  ;;  %v375_v50 = vpop.permute.xlu0 %374  ;;  %v234_v59 = vrot.slane %v233_v51, 2  ;;  %v252_v13 = vsub.s32 %v249_v63, %v251_v1 }
 0x107   :  { %504 = vpow2.f32 %v130_v29  ;;  %v377_v55 = vsub.f32 %v853_v21, %v375_v50  ;;  %v378_v56 = vadd.f32 %v375_v50, %v853_v21  ;;  %v890_v29 = vld [vmem:[#allocation15] sm:$0xff]  ;;  %v213_v6 = vadd.f32 %v212_v28, %v211_v25 }
 0x108   :  { %v240_v45 = vadd.f32 %v239_v38, %v238_v34  ;;  %v235_v2 = vadd.f32 %v234_v59, %v233_v51  ;;  %vm348_vm10 = vcmp.gt.f32.partialorder %v890_v29, 0.0 }
 0x109   :  { %v398_v61 = vmin.f32 %v378_v56, %v385_v54  ;;  %v399_v62 = vmax.f32 %v377_v55, %v384_v53  ;;  %v407_v4 = vmax.f32 %v378_v56, %v385_v54  ;;  %v408_v5 = vmin.f32 %v377_v55, %v384_v53 }
 0x10a   :  { %v241_v48 = vrot.slane %v240_v45, 2  ;;  %v386_v10 = vsub.f32 %v378_v56, %v377_v55  ;;  %v236_v14 = vrot.slane %v235_v2, 1  ;;  %v214_v32 = vrot.slane %v213_v6, 1 }
 0x10b   :  { %v878_v11 = vsub.f32 %v398_v61, %v399_v62  ;;  %v882_v17 = vsub.f32 %v407_v4, %v408_v5  ;;  %v351_v34 = vsel %vm348_vm10, 1, %v692_v0 }
 0x10c   :  { %v242_v52 = vadd.f32 %v241_v48, %v240_v45  ;;  %v237_v20 = vadd.f32 %v236_v14, %v235_v2  ;;  %v215_v33 = vadd.f32 %v214_v32, %v213_v6  ;;  %v177_v32 = vld [vmem:[#allocation2 + $0x1] sm:$0x1] }
 0x10d   :  { %v503_v35 = vpop.eup %502  ;;  %v401_v16 = vmax.f32 %v878_v11, 0.0  ;;  %v410_v24 = vmax.f32 %v882_v17, 0.0  ;;  %v228_v11 = vld [vmem:[#allocation4] sm:$0x1] }
 0x10e   :  { %v132_v37 = vsel %vm119_vm1, %v503_v35, 0.0  ;;  %v243_v60 = vrot.slane %v242_v52, 1  ;;  %v253_v27 = vrot.slane %v237_v20, %v252_v13  ;;  %v201_v35 = vld [vmem:[#allocation3 + $0x1] sm:$0x1] }
 0x10f   :  { %133 = vadd.xlane.f32.xlu1 %v132_v37  ;;  %v217_v36 = vadd.f32 %v215_v33, %v201_v35  ;;  %v303_v37 = vld [vmem:[#allocation3] sm:$0x1] }
 0x110   :  { %v244_v3 = vadd.f32 %v243_v60, %v242_v52  ;;  %v260_v30 = vrot.slane %v253_v27, %v252_v13  ;;  %v305_v39 = vsel %vm108_vm0, %v303_v37, 0.0 }
 0x111   :  { %v505_v41 = vpop.eup %504  ;;  %219 = vst.msk [vmem:[#allocation3 + $0x1] sm:$0x1] %vm108_vm0, %v217_v36 }
 0x112   :  { %v135_v43 = vsel %vm119_vm1, %v505_v41, 0.0  ;;  %v267_v15 = vrot.slane %v244_v3, %v252_v13 }
 0x113   :  { %157 = vadd.xlane.f32.xlu1 %v156_v40  ;;  %136 = vadd.xlane.f32.xlu0 %v135_v43 }
 0x114   :  { %v274_v8 = vrot.slane %v267_v15, %v252_v13 }
 0x117   :  { %160 = vadd.xlane.f32.xlu1 %v159_v46  ;;  %v229_v46 = vld [vmem:[#allocation4 + $0x1] sm:$0x1] }
 0x118   :  { %v304_v38 = vld [vmem:[#allocation3 + $0x1] sm:$0x1] }
 0x119   :  { %v306_v40 = vsel %vm108_vm0, %v304_v38, 0.0 }
 0x11a   :  { %v307_v41 = vadd.f32 %v306_v40, %v305_v39  ;;  %v323_v39 = vld [vmem:[#allocation11] sm:$0x1] }
 0x128   :  { %388 = vrot.lane.b32.xlu1 %v386_v10, %s697_s0 }
 0x129   :  { %394 = vrot.lane.b32.xlu0 %v392_v12, %s697_s0 }
 0x12c   :  { %403 = vrot.lane.b32.xlu1 %v401_v16, %s697_s0 }
 0x12d   :  { %277 = vrot.lane.b32.xlu0 %v274_v8, %s698_s13 }
 0x130   :  { %412 = vrot.lane.b32.xlu1 %v410_v24, %s697_s0 }
 0x134   :  { %275 = vrot.lane.b32.xlu1 %v260_v30, %s698_s13 }
 0x138   :  { %353 = vperm.xlu1 %500, %v351_v34  }
 0x15c   :  { %308 = vadd.xlane.f32.xlu1 %v307_v41 }
 0x19c   :  { %v134_v42 = vpop.xlane.xlu1 %133 }
 0x19d   :  { %506 = vlog2.f32 %v134_v42  ;;  %v324_v42 = vld [vmem:[#allocation11 + $0x1] sm:$0x1] }
 0x1a0   :  { %v158_v43 = vpop.xlane.xlu1 %157  ;;  %v137_v44 = vpop.xlane.xlu0 %136 }
 0x1a1   :  { %508 = vlog2.f32 %v137_v44 }
 0x1a4   :  { %v161_v45 = vpop.xlane.xlu1 %160  ;;  %v395_v0 = vpop.permute.xlu0 %394 }
 0x1a5   :  { %v397_v55 = vmul.f32 %v395_v0, %v392_v12 }
 0x1a7   :  { %v507_v47 = vpop.eup %506 }
 0x1a8   :  { %v139_v48 = vmul.f32 0.6931472, %v507_v47  ;;  %v389_v49 = vpop.permute.xlu1 %388  ;;  %v278_v50 = vpop.permute.xlu0 %277 }
 0x1a9   :  { %v391_v51 = vmul.f32 %v389_v49, %v386_v10  ;;  %v282_v52 = vadd.f32 %v278_v50, %v229_v46  ;;  %v349_v49 = vsub.f32 %v853_v21, %v845_v9 }
 0x1aa   :  { %v142_v53 = vadd.f32 %v139_v48, %v856_v23 }
 0x1ab   :  { %v509_v54 = vpop.eup %508  ;;  %284 = vst.msk [vmem:[#allocation4 + $0x1] sm:$0x1] %vm108_vm0, %v282_v52  ;;  %v416_v59 = vadd.f32 %v397_v55, %v391_v51  ;;  %v350_v55 = vand.u32 2147483647, %v349_v49 }
 0x1ac   :  { %v162_v56 = vsub.f32 %v142_v53, %v158_v43  ;;  %v141_v57 = vmul.f32 0.6931472, %v509_v54  ;;  %v404_v58 = vpop.permute.xlu1 %403 }
 0x1ad   :  { %v406_v60 = vmul.f32 %v404_v58, %v401_v16 }
 0x1ae   :  { %v178_v61 = vmul.f32 %v841_v7, %v162_v56  ;;  %v143_v62 = vadd.f32 %v141_v57, %v859_v26 }
 0x1af   :  { %v417_v63 = vsub.f32 %v416_v59, %v406_v60 }
 0x1b0   :  { %v181_v1 = vsel %vm180_vm2, %v178_v61, 0.0  ;;  %v163_v2 = vsub.f32 %v143_v62, %v161_v45  ;;  %v413_v3 = vpop.permute.xlu1 %412 }
 0x1b1   :  { %v182_v4 = vrot.slane %v181_v1, 4  ;;  %v418_v23 = vsel %vm348_vm10, %v417_v63, 1.0  ;;  %v415_v5 = vmul.f32 %v413_v3, %v410_v24 }
 0x1b2   :  { %v179_v10 = vmul.f32 %v885_v18, %v163_v2  ;;  %510 = vrcp.f32 %v418_v23  ;;  %v176_v18 = vld [vmem:[#allocation2] sm:$0x1]  ;;  %v322_v41 = vld [vmem:[#allocation4 + $0x1] sm:$0x1] }
 0x1b3   :  { %v183_v12 = vadd.f32 %v182_v4, %v181_v1  ;;  %v419_v7 = vsel %vm348_vm10, %v415_v5, 1.0  ;;  %v326_v0 = vsub.f32 %v322_v41, %v324_v42 }
 0x1b4   :  { %v188_v26 = vsel %vm180_vm2, %v179_v10, 0.0  ;;  %512 = vrcp.f32 %v419_v7  ;;  %v276_v13 = vpop.permute.xlu1 %275  ;;  %v422_v6 = vsub.f32 %v419_v7, %v418_v23 }
 0x1b5   :  { %v184_v14 = vrot.slane %v183_v12, 2  ;;  %v189_v15 = vrot.slane %v188_v26, 4  ;;  %v281_v16 = vadd.f32 %v276_v13, %v228_v11  ;;  %v328_v52 = vand.u32 2147483647, %v326_v0 }
 0x1b7   :  { %v185_v17 = vadd.f32 %v184_v14, %v183_v12  ;;  %v190_v19 = vadd.f32 %v189_v15, %v188_v26  ;;  %283 = vst.msk [vmem:[#allocation4] sm:$0x1] %vm108_vm0, %v281_v16  ;;  %v330_v56 = vsel %vm108_vm0, %v328_v52, 0.0 }
 0x1b8   :  { %v354_v53 = vpop.permute.xlu1 %353 }
 0x1b9   :  { %v186_v20 = vrot.slane %v185_v17, 1  ;;  %v191_v22 = vrot.slane %v190_v19, 2  ;;  %vm355_vm11 = vcmp.eq.s32.totalorder %v354_v53, 1 }
 0x1ba   :  { %v356_v58 = vsel %vm355_vm11, %v350_v55, 0.0 }
 0x1bb   :  { %v187_v8 = vadd.f32 %v186_v20, %v185_v17  ;;  %v192_v24 = vadd.f32 %v191_v22, %v190_v19  ;;  %v358_v59 = vsel %vm357_vm12, %v356_v58, 0.0 }
 0x1bc   :  { %v511_v25 = vpop.eup %510 }
 0x1bd   :  { %v195_v27 = vadd.f32 %v187_v8, %v176_v18  ;;  %v193_v28 = vrot.slane %v192_v24, 1  ;;  %v421_v34 = vmul.f32 %v511_v25, %v406_v60 }
 0x1be   :  { %v513_v30 = vpop.eup %512  ;;  %v321_v38 = vld [vmem:[#allocation4] sm:$0x1] }
 0x1bf   :  { %198 = vst.msk [vmem:[#allocation2] sm:$0x1] %vm108_vm0, %v195_v27  ;;  %v194_v33 = vadd.f32 %v193_v28, %v192_v24  ;;  %v424_v35 = vmul.f32 %v513_v30, %v422_v6  ;;  %v325_v44 = vsub.f32 %v321_v38, %v323_v39 }
 0x1c1   :  { %v196_v36 = vadd.f32 %v194_v33, %v177_v32  ;;  %v425_v37 = vsub.f32 %v421_v34, %v424_v35  ;;  %v327_v47 = vand.u32 2147483647, %v325_v44  ;;  %v369_v34 = vstv %s947_s6  ;;  %s699_s6 = smov [#allocation17]  }
 0x1c2   :  { %514 = vrcp.f32 %v369_v34  ;;  %s458_s10 = sshll.u32 %s699_s6, 4  ;;  %s459_s10 = int_to_ptr.vmem [resolvable:$true] %s458_s10 }
 0x1c3   :  { %199 = vst.msk [vmem:[#allocation2 + $0x1] sm:$0x1] %vm108_vm0, %v196_v36  ;;  %v426_v40 = vsub.f32 1.0, %v425_v37  ;;  %v329_v29 = vsel %vm108_vm0, %v327_v47, 0.0  ;;  %s650_s11 = scalar_lea.vmem %s459_s10, 16  ;;  %s654_s12 = scalar_lea.vmem %s459_s10, 32 }
 0x1c4   :  { %v331_v57 = vadd.f32 %v330_v56, %v329_v29  ;;  %p651_p6 = scmp.ne.s32.totalorder %s459_s10, %s650_s11  ;;  %p655_p7 = scmp.lt.s32.totalorder %s459_s10, %s459_s10 }
 0x1c5   :  { %v427_v43 = vsel %vm348_vm10, %v426_v40, 0.0  ;;  %p656_p8 = scmp.lt.s32.totalorder %s654_s12, %s650_s11 }
 0x1c6   :  { %v428_v45 = vsel %vm180_vm2, %v427_v43, 0.0  ;;  %v288_v46 = vld [vmem:[#allocation2] sm:$0x1] }
 0x1c7   :  { %429 = vadd.xlane.f32.xlu1 %v428_v45  ;;  %v290_v50 = vsel %vm108_vm0, %v288_v46, 0.0  ;;  %p657_p9 = por %p656_p8, %p655_p7 }
 0x1c9   :  { %p658_p10 = pnand %p657_p9, %p651_p6 }
 0x1ca   :  { %v289_v48 = vld [vmem:[#allocation2 + $0x1] sm:$0x1] }
 0x1cb   :  { %v291_v51 = vsel %vm108_vm0, %v289_v48, 0.0  ;;  %vm448_vm0 = vcmp.eq.s32.totalorder %v863_v31, 3 }
 0x1cc   :  { %v292_v54 = vadd.f32 %v291_v51, %v290_v50  ;;  %v515_v38 = vpop.eup %514 }
 0x1ce   :  { %293 = vadd.xlane.f32.xlu0 %v292_v54 }
 0x1d2   :  { %332 = vadd.xlane.f32.xlu0 %v331_v57 }
 0x1d6   :  { %359 = vadd.xlane.f32.xlu0 %v358_v59 }
 0x1e9   :  { %v309_v9 = vpop.xlane.xlu1 %308 }
 0x1ea   :  { %v310_v21 = vrot.slane %v309_v9, 4 }
 0x1ec   :  { %v311_v60 = vadd.f32 %v310_v21, %v309_v9 }
 0x1ee   :  { %v312_v62 = vrot.slane %v311_v60, 2 }
 0x1f0   :  { %v313_v5 = vadd.f32 %v312_v62, %v311_v60 }
 0x1f2   :  { %v314_v14 = vrot.slane %v313_v5, 1 }
 0x1f4   :  { %v315_v8 = vadd.f32 %v314_v14, %v313_v5 }
 0x254   :  { %v430_v61 = vpop.xlane.xlu1 %429 }
 0x255   :  { %v431_v63 = vrot.slane %v430_v61, 4 }
 0x257   :  { %v432_v4 = vadd.f32 %v431_v63, %v430_v61 }
 0x259   :  { %v433_v26 = vrot.slane %v432_v4, 2 }
 0x25b   :  { %v294_v1 = vpop.xlane.xlu0 %293  ;;  %v434_v18 = vadd.f32 %v433_v26, %v432_v4 }
 0x25c   :  { %v295_v2 = vrot.slane %v294_v1, 4 }
 0x25d   :  { %v435_v6 = vrot.slane %v434_v18, 1 }
 0x25e   :  { %v296_v3 = vadd.f32 %v295_v2, %v294_v1 }
 0x25f   :  { %v333_v23 = vpop.xlane.xlu0 %332  ;;  %v436_v33 = vadd.f32 %v435_v6, %v434_v18 }
 0x260   :  { %v297_v10 = vrot.slane %v296_v3, 2  ;;  %v334_v11 = vrot.slane %v333_v23, 4 }
 0x262   :  { %v335_v12 = vadd.f32 %v334_v11, %v333_v23  ;;  %v298_v7 = vadd.f32 %v297_v10, %v296_v3 }
 0x263   :  { %v360_v13 = vpop.xlane.xlu0 %359 }
 0x264   :  { %v336_v15 = vrot.slane %v335_v12, 2  ;;  %v361_v16 = vrot.slane %v360_v13, 4  ;;  %v299_v17 = vrot.slane %v298_v7, 1 }
 0x266   :  { %v362_v19 = vadd.f32 %v361_v16, %v360_v13  ;;  %v300_v20 = vadd.f32 %v299_v17, %v298_v7  ;;  %v337_v22 = vadd.f32 %v336_v15, %v335_v12 }
 0x268   :  { %v363_v24 = vrot.slane %v362_v19, 2  ;;  %472 = vpush %v300_v20  ;;  %v338_v25 = vrot.slane %v337_v22, 1 }
 0x269   :  { %474 = vpush %v315_v8 }
 0x26a   :  { %v364_v27 = vadd.f32 %v363_v24, %v362_v19  ;;  %v339_v28 = vadd.f32 %v338_v25, %v337_v22 }
 0x26c   :  { %476 = vpush %v339_v28  ;;  %v365_v30 = vrot.slane %v364_v27, 1 }
 0x26e   :  { %v366_v32 = vadd.f32 %v365_v30, %v364_v27 }
 0x270   :  { %478 = vpush %v366_v32 }
 0x271   :  { %480 = vpush %v436_v33 }
 0x299   :  { %s473_s14 = spop %472 }
 0x29a   :  { %s475_s28 = spop %474  ;;  %v302_v42 = vstv %s473_s14 }
 0x29b   :  { %v317_v35 = vstv %s475_s28 }
 0x29c   :  { %v318_v36 = vmax.f32 %v317_v35, 1e-12 }
 0x29d   :  { %s477_s29 = spop %476 }
 0x29e   :  { %516 = vrcp.f32 %v318_v36  ;;  %v341_v37 = vstv %s477_s29 }
 0x29f   :  { %v343_v40 = vmul.f32 0.5, %v341_v37 }
 0x2a1   :  { %s479_s8 = spop %478  ;;  %v443_v46 = vsel %vm442_vm14, %v343_v40, 0.0 }
 0x2a2   :  { %s481_s9 = spop %480  ;;  %v368_v39 = vstv %s479_s8 }
 0x2a3   :  { %v438_v43 = vstv %s481_s9  ;;  %v371_v45 = vmul.f32 %v515_v38, %v368_v39 }
 0x2a4   :  { %v439_v47 = vmul.f32 %v515_v38, %v438_v43 }
 0x2a5   :  { %v446_v49 = vsel %vm445_vm15, %v371_v45, 0.0 }
 0x2a6   :  { %v449_v51 = vsel %vm448_vm0, %v439_v47, 0.0 }
 0x2a8   :  { %v517_v41 = vpop.eup %516 }
 0x2a9   :  { %v320_v44 = vmul.f32 %v517_v41, %v302_v42 }
 0x2ab   :  { %v441_v0 = vsel %vm440_vm13, %v320_v44, 0.0 }
 0x2ac   :  { %v444_v48 = vadd.f32 %v443_v46, %v441_v0 }
 0x2ae   :  { %v447_v50 = vadd.f32 %v446_v49, %v444_v48 }
 0x2b0   :  { %v450_v52 = vadd.f32 %v449_v51, %v447_v50 }
 0x2b2   :  { %451 = vst [vmem:[#allocation17] sm:$0x1] %v450_v52 }
 0x2b3   :  { %661 = shalt.err (!%p658_p10)
}
 0x2b4   :  { %s662_s3 = scalar_lea.hbm %s948_s7, 16 }
 0x2b5   :  { %p663_p11 = scmp.ne.s32.totalorder %s948_s7, %s662_s3  ;;  %p666_p12 = scmp.lt.u32.totalorder %s662_s3, %s948_s7 }
 0x2b7   :  { %p668_p13 = pnand %p666_p12, %p663_p11 }
 0x2b9   :  { %671 = shalt.err (!%p668_p13)
}
 0x2ba   :  { %461 = dma.vmem_to_hbm [thread:$0]  %s459_s10, 16, %s948_s7, [#allocation8]  }
 0x2bb   :  { %680 = dma.done.wait [#allocation8], 16  }
 0x2bc   :  { %681 = vsyncadd [#allocation8], 4294967280 }
 0x2bd   :  { %465 = vsyncpa [#allocation7], 1 }
 0x2be   :  { %466 = vsyncpa [#allocation10], 1 }
 0x2bf   :  { %467 = vsyncpa [#allocation13], 1 }
 0x2c0   :  { %468 = vsyncpa [#allocation16], 1 }
 0x2c1   :  { %469 = vsyncpa [#allocation8], 1 }

</bundles_post_ra>
